<compile_context>
chip_gen: v6e
topology: v6e:2x2x1
jax: 0.10.0
libtpu: 0.0.40
codegen_flags: <defaults>
</compile_context>

<pallas_src>
import functools

import jax
import jax.numpy as jnp
from jax.experimental import pallas as pl
from jax.experimental.pallas import tpu as pltpu

LANE = 128  # all feature dims and N are padded to a multiple of the lane width


def _round_up(x, m):
    return ((x + m - 1) // m) * m


def _vmem_budget_bytes():
    """Generation-aware VMEM budget (leave headroom below physical capacity)."""
    try:
        info = pltpu.get_tpu_info()
        cap = int(getattr(info, "vmem_capacity_bytes", 64 << 20))
    except Exception:
        cap = 64 << 20  # conservative (v7x-sized) fallback
    return max(32 << 20, cap - (16 << 20))   # v7x: ~48 MiB, v5e/v6e: ~112 MiB


def _pick_tile(n_pad, target, min_tiles=1):
    """Largest multiple-of-128 divisor of n_pad that is <= target and leaves
    at least `min_tiles` tiles.  n_pad is always a multiple of 128."""
    best = 128
    t = 128
    while t <= n_pad and t <= target:
        if n_pad % t == 0 and (n_pad // t) >= min_tiles:
            best = t
        t += 128
    return best


# ----------------------------------------------------------------------------
# Kernel 1: row-tiled dense feature transform  HW = H @ W   (hoisted per layer)
# ----------------------------------------------------------------------------
def _transform_kernel(h_ref, w_ref, o_ref):
    o_ref[...] = jnp.dot(h_ref[...], w_ref[...],
                         preferred_element_type=jnp.float32).astype(o_ref.dtype)


def dense_transform(h, w, *, vmem_limit, out_dtype=jnp.bfloat16):
    n_pad, f_in = h.shape
    f_out = w.shape[1]
    tm = _pick_tile(n_pad, 512, min_tiles=2 if n_pad >= 256 else 1)
    grid = (n_pad // tm,)
    flops = 2 * n_pad * f_in * f_out
    bytes_accessed = (h.size * h.dtype.itemsize + w.size * w.dtype.itemsize
                      + n_pad * f_out * jnp.dtype(out_dtype).itemsize)
    return pl.pallas_call(
        _transform_kernel,
        out_shape=jax.ShapeDtypeStruct((n_pad, f_out), out_dtype),
        grid_spec=pltpu.PrefetchScalarGridSpec(
            num_scalar_prefetch=0,
            grid=grid,
            in_specs=[
                pl.BlockSpec((tm, f_in), lambda i: (i, 0)),     # H row tile
                pl.BlockSpec((f_in, f_out), lambda i: (0, 0)),  # W resident
            ],
            out_specs=pl.BlockSpec((tm, f_out), lambda i: (i, 0)),
        ),
        compiler_params=pltpu.CompilerParams(
            dimension_semantics=("parallel",),
            vmem_limit_bytes=vmem_limit),
        cost_estimate=pl.CostEstimate(flops=int(flops), transcendentals=0,
                                      bytes_accessed=int(bytes_accessed)),
    )(h, w)


# ----------------------------------------------------------------------------
# Kernel 2: tiled aggregation  Y[i] = sum_k A[i,k] @ HW[k]  (+ b, opt. ReLU)
# ----------------------------------------------------------------------------
def _aggregate_kernel(a_ref, hw_ref, b_ref, o_ref, acc_ref, *, apply_relu):
    k = pl.program_id(1)

    @pl.when(k == 0)
    def _():
        acc_ref[...] = jnp.zeros_like(acc_ref)

    acc_ref[...] += jnp.dot(a_ref[...], hw_ref[...],
                            preferred_element_type=jnp.float32)

    @pl.when(k == pl.num_programs(1) - 1)
    def _():
        y = acc_ref[...] + b_ref[...]
        if apply_relu:
            y = jnp.maximum(y, 0.0)
        o_ref[...] = y.astype(o_ref.dtype)


def gcn_aggregate(a_pad, hw, b, *, apply_relu, out_dtype, vmem_limit):
    n_pad = a_pad.shape[0]
    f_out = hw.shape[1]
    # Big tiles for the HBM-bound A stream; keep >=2 row tiles for v7x's 2 TCs.
    tm = _pick_tile(n_pad, 512, min_tiles=2 if n_pad >= 256 else 1)
    tk = _pick_tile(n_pad, 1024, min_tiles=1)
    grid = (n_pad // tm, n_pad // tk)

    flops = 2 * n_pad * n_pad * f_out
    bytes_accessed = (a_pad.size * a_pad.dtype.itemsize
                      + hw.size * hw.dtype.itemsize * grid[0]   # HW re-streamed per row tile
                      + b.size * b.dtype.itemsize
                      + n_pad * f_out * jnp.dtype(out_dtype).itemsize)

    kernel = functools.partial(_aggregate_kernel, apply_relu=apply_relu)
    return pl.pallas_call(
        kernel,
        out_shape=jax.ShapeDtypeStruct((n_pad, f_out), out_dtype),
        grid_spec=pltpu.PrefetchScalarGridSpec(
            num_scalar_prefetch=0,
            grid=grid,
            in_specs=[
                pl.BlockSpec((tm, tk), lambda i, k: (i, k)),      # A tile (bf16)
                pl.BlockSpec((tk, f_out), lambda i, k: (k, 0)),   # HW tile (bf16)
                pl.BlockSpec((1, f_out), lambda i, k: (0, 0)),    # bias resident
            ],
            out_specs=pl.BlockSpec((tm, f_out), lambda i, k: (i, 0)),
            scratch_shapes=[pltpu.VMEM((tm, f_out), jnp.float32)],
        ),
        compiler_params=pltpu.CompilerParams(
            dimension_semantics=("parallel", "arbitrary"),
            vmem_limit_bytes=vmem_limit),
        cost_estimate=pl.CostEstimate(flops=int(flops), transcendentals=0,
                                      bytes_accessed=int(bytes_accessed)),
    )(a_pad, hw, b)


# ----------------------------------------------------------------------------
# Kernel 3: VMEM-resident fused fast path (A_hat fits in VMEM): all 3 layers in
# one pallas_call; A is DMA'd from HBM exactly once and every row is resident,
# which makes the cross-layer fusion legal.
# ----------------------------------------------------------------------------
def _gcn3_fused_kernel(a_ref, xw1_ref, w2_ref, w3_ref,
                       b1_ref, b2_ref, b3_ref, o_ref):
    a = a_ref[...]
    h1 = jnp.dot(a, xw1_ref[...], preferred_element_type=jnp.float32)
    h1 = jnp.maximum(h1 + b1_ref[...], 0.0).astype(jnp.bfloat16)
    hw2 = jnp.dot(h1, w2_ref[...],
                  preferred_element_type=jnp.float32).astype(jnp.bfloat16)
    h2 = jnp.dot(a, hw2, preferred_element_type=jnp.float32)
    h2 = jnp.maximum(h2 + b2_ref[...], 0.0).astype(jnp.bfloat16)
    hw3 = jnp.dot(h2, w3_ref[...],
                  preferred_element_type=jnp.float32).astype(jnp.bfloat16)
    y = jnp.dot(a, hw3, preferred_element_type=jnp.float32) + b3_ref[...]
    o_ref[...] = y.astype(o_ref.dtype)


def gcn3_fused(a_pad, xw1, w2, w3, b1, b2, b3, *, vmem_limit):
    n_pad, hid_pad = xw1.shape
    out_pad = w3.shape[1]
    flops = (2 * n_pad * n_pad * (2 * hid_pad + out_pad)
             + 2 * n_pad * (hid_pad * hid_pad + hid_pad * out_pad))
    bytes_accessed = (a_pad.size * a_pad.dtype.itemsize
                      + xw1.size * xw1.dtype.itemsize
                      + w2.size * w2.dtype.itemsize + w3.size * w3.dtype.itemsize
                      + (b1.size + b2.size + b3.size) * 4
                      + n_pad * out_pad * 4)
    return pl.pallas_call(
        _gcn3_fused_kernel,
        out_shape=jax.ShapeDtypeStruct((n_pad, out_pad), jnp.float32),
        compiler_params=pltpu.CompilerParams(vmem_limit_bytes=vmem_limit),
        cost_estimate=pl.CostEstimate(flops=int(flops), transcendentals=0,
                                      bytes_accessed=int(bytes_accessed)),
    )(a_pad, xw1, w2, w3, b1, b2, b3)


# ----------------------------------------------------------------------------
# Plain-JAX glue: normalized adjacency (PyG GCNConv / gcn_norm semantics).
#   A_hat = D^-1/2 (A + self_loops) D^-1/2, message flows src -> dst.
# Self-loops follow add_remaining_self_loops: a node that already has a
# self-loop keeps its weight; otherwise a weight-1 self-loop is inserted.
# (Duplicate self-loops on the same node sum — negligible corner case.)
# ----------------------------------------------------------------------------
def build_norm_adj(edge_index, num_nodes, edge_weight=None):
    src = edge_index[0]
    dst = edge_index[1]
    if edge_weight is None:
        edge_weight = jnp.ones(src.shape[0], dtype=jnp.float32)
    else:
        edge_weight = edge_weight.astype(jnp.float32)
    self_mask = src == dst

    adj = jnp.zeros((num_nodes, num_nodes), jnp.float32)
    adj = adj.at[dst, src].add(jnp.where(self_mask, 0.0, edge_weight))

    sl_w = jnp.zeros((num_nodes,), jnp.float32).at[src].add(
        jnp.where(self_mask, edge_weight, 0.0))
    has_sl = jnp.zeros((num_nodes,), jnp.float32).at[src].add(
        self_mask.astype(jnp.float32)) > 0
    loop_w = jnp.where(has_sl, sl_w, 1.0)
    adj = adj + jnp.diag(loop_w)

    deg = jnp.sum(adj, axis=1)
    d_inv_sqrt = jnp.where(deg > 0, jax.lax.rsqrt(deg), 0.0)
    return d_inv_sqrt[:, None] * adj * d_inv_sqrt[None, :]


def _pad2(m, rows, cols, dtype):
    out = jnp.zeros((rows, cols), dtype)
    return out.at[:m.shape[0], :m.shape[1]].set(m.astype(dtype))


def prepare_adjacency(edge_index, num_nodes, edge_weight=None):
    """Build + pad + cast A_hat once. For a static graph, call this once and
    pass the result to gcn3_forward(..., a_pad=...) on every step."""
    n_pad = _round_up(num_nodes, LANE)
    a_hat = build_norm_adj(edge_index, num_nodes, edge_weight)
    return _pad2(a_hat, n_pad, n_pad, jnp.bfloat16)


# ----------------------------------------------------------------------------
# Full forward pass.
# ----------------------------------------------------------------------------
def gcn3_forward(x, edge_index, params, edge_weight=None, a_pad=None,
                 force_tiled=False):
    n, in_ch = x.shape
    num_hid = params["w1"].shape[1]
    out_ch = params["w3"].shape[1]

    n_pad = _round_up(n, LANE)
    in_pad = _round_up(in_ch, LANE)
    hid_pad = _round_up(num_hid, LANE)
    out_pad = _round_up(out_ch, LANE)

    if a_pad is None:
        a_pad = prepare_adjacency(edge_index, n, edge_weight)

    # Lane-dense padded operands; bf16 MXU path, f32 biases (added to f32 acc).
    x_p = _pad2(x, n_pad, in_pad, jnp.bfloat16)
    w1 = _pad2(params["w1"], in_pad, hid_pad, jnp.bfloat16)
    w2 = _pad2(params["w2"], hid_pad, hid_pad, jnp.bfloat16)
    w3 = _pad2(params["w3"], hid_pad, out_pad, jnp.bfloat16)
    b1 = _pad2(params["b1"], 1, hid_pad, jnp.float32)
    b2 = _pad2(params["b2"], 1, hid_pad, jnp.float32)
    b3 = _pad2(params["b3"], 1, out_pad, jnp.float32)

    vmem_limit = _vmem_budget_bytes()

    # TODO(synk): dropout runs as identity (eval mode); training-mode dropout
    # would need pltpu.prng_seed + pltpu.stateful_bernoulli inside the kernels.
    # TODO(synk): very sparse / very large graphs would benefit from
    # block-sparse tile skipping via PrefetchScalarGridSpec (data-dependent
    # A-tile index_map) and fp8 A on v7x; not needed at these sizes.

    # Layer-1 feature transform is always hoisted (and re-used by both paths).
    xw1 = dense_transform(x_p, w1, vmem_limit=vmem_limit)

    # Fused VMEM-resident fast path when A_hat (+ activations) fits on chip.
    a_bytes = n_pad * n_pad * a_pad.dtype.itemsize
    fmax = max(hid_pad, out_pad)
    fused_footprint = (2 * a_bytes                       # A (buffering slack)
                       + 10 * n_pad * fmax * 4           # f32/bf16 intermediates
                       + 4 * hid_pad * fmax * 2)         # resident weights
    use_fused = (not force_tiled) and fused_footprint <= vmem_limit

    if use_fused:
        y = gcn3_fused(a_pad, xw1, w2, w3, b1, b2, b3, vmem_limit=vmem_limit)
    else:
        h1 = gcn_aggregate(a_pad, xw1, b1, apply_relu=True,
                           out_dtype=jnp.bfloat16, vmem_limit=vmem_limit)
        hw2 = dense_transform(h1, w2, vmem_limit=vmem_limit)
        h2 = gcn_aggregate(a_pad, hw2, b2, apply_relu=True,
                           out_dtype=jnp.bfloat16, vmem_limit=vmem_limit)
        hw3 = dense_transform(h2, w3, vmem_limit=vmem_limit)
        y = gcn_aggregate(a_pad, hw3, b3, apply_relu=False,
                          out_dtype=jnp.float32, vmem_limit=vmem_limit)

    return y[:n, :out_ch]


# Plain-JAX (f32) reference for validation.
def gcn3_reference(x, edge_index, params, edge_weight=None):
    a_hat = build_norm_adj(edge_index, x.shape[0], edge_weight)
    h = jnp.maximum(a_hat @ (x @ params["w1"]) + params["b1"], 0.0)
    h = jnp.maximum(a_hat @ (h @ params["w2"]) + params["b2"], 0.0)
    return a_hat @ (h @ params["w3"]) + params["b3"]


# ----------------------------------------------------------------------------
# Deterministic parameter init (glorot-uniform weights, zero biases).
# ----------------------------------------------------------------------------
def init_params(key, in_channels, num_hid, out_channels):
    def glorot(k, fan_in, fan_out):
        lim = jnp.sqrt(6.0 / (fan_in + fan_out))
        return jax.random.uniform(k, (fan_in, fan_out), jnp.float32, -lim, lim)

    k1, k2, k3 = jax.random.split(key, 3)
    return {
        "w1": glorot(k1, in_channels, num_hid),
        "b1": jnp.zeros((1, num_hid), jnp.float32),
        "w2": glorot(k2, num_hid, num_hid),
        "b2": jnp.zeros((1, num_hid), jnp.float32),
        "w3": glorot(k3, num_hid, out_channels),
        "b3": jnp.zeros((1, out_channels), jnp.float32),
    }


if __name__ == "__main__":
    key = jax.random.PRNGKey(0)
    k_x, k_e, k_p, k_x2, k_e2 = jax.random.split(key, 5)

    # Small demo (module-default shapes) -> exercises the fused VMEM path.
    N, IN_CH, NUM_HID, OUT_CH, E = 32, 8, 16, 4, 64
    x = jax.random.normal(k_x, (N, IN_CH), dtype=jnp.float32)
    edge_index = jax.random.randint(k_e, (2, E), 0, N, dtype=jnp.int32)
    params = init_params(k_p, IN_CH, NUM_HID, OUT_CH)

    out = gcn3_forward(x, edge_index, params)
    jax.block_until_ready(out)
    assert out.shape == (N, OUT_CH)
    assert bool(jnp.all(jnp.isfinite(out)))
    ref = gcn3_reference(x, edge_index, params)
    err_fused = float(jnp.max(jnp.abs(out - ref)))
    assert err_fused < 0.1, f"fused path mismatch: {err_fused}"

    # Slightly larger graph, forced through the tiled (grid) path.
    N2, E2 = 300, 1200
    x2 = jax.random.normal(k_x2, (N2, IN_CH), dtype=jnp.float32)
    edge_index2 = jax.random.randint(k_e2, (2, E2), 0, N2, dtype=jnp.int32)
    a_pad2 = prepare_adjacency(edge_index2, N2)          # built once, reused
    out2 = gcn3_forward(x2, edge_index2, params, a_pad=a_pad2, force_tiled=True)
    jax.block_until_ready(out2)
    assert out2.shape == (N2, OUT_CH)
    assert bool(jnp.all(jnp.isfinite(out2)))
    ref2 = gcn3_reference(x2, edge_index2, params)
    err_tiled = float(jnp.max(jnp.abs(out2 - ref2)))
    assert err_tiled < 0.1, f"tiled path mismatch: {err_tiled}"

    print("KERNEL_OK")
</pallas_src>

<mosaic_0001>
module attributes {stable_mosaic.version = 11 : i64} {
  func.func @_transform_kernel(%arg0: i32, %arg1: memref<128x128xbf16, #tpu.memory_space<vmem>>, %arg2: memref<128x128xbf16, #tpu.memory_space<vmem>>, %arg3: memref<128x128xbf16, #tpu.memory_space<vmem>>) attributes {dimension_semantics = [#tpu.dimension_semantics<parallel>], iteration_bounds = array<i64: 1>, scalar_prefetch = 0 : i64, scratch_operands = 0 : i64, tpu.core_type = #tpu.core_type<tc>, window_params = [{transform_indices = @transform_0, window_bounds = array<i64: 128, 128>}, {pipeline_mode = #tpu.pipeline_mode<synchronous>, transform_indices = @transform_1, window_bounds = array<i64: 128, 128>}, {transform_indices = @transform_2, window_bounds = array<i64: 128, 128>}]} {
    %c0 = arith.constant 0 : index
    %c0_0 = arith.constant 0 : index
    %0 = vector.load %arg1[%c0, %c0_0] : memref<128x128xbf16, #tpu.memory_space<vmem>>, vector<128x128xbf16>
    %c0_1 = arith.constant 0 : index
    %c0_2 = arith.constant 0 : index
    %1 = vector.load %arg2[%c0_1, %c0_2] : memref<128x128xbf16, #tpu.memory_space<vmem>>, vector<128x128xbf16>
    %cst = arith.constant dense<0.000000e+00> : vector<128x128xf32>
    %2 = tpu.matmul %0, %1, %cst {dimension_numbers = #tpu.dot_dimension_numbers<[1], [0], [0], [1], [0, 0, 1, 1], [], []>} : vector<128x128xbf16>, vector<128x128xbf16>, vector<128x128xf32> -> vector<128x128xf32>
    %3 = arith.truncf %2 : vector<128x128xf32> to vector<128x128xbf16>
    %c0_3 = arith.constant 0 : index
    %c0_4 = arith.constant 0 : index
    %4 = vector.load %arg3[%c0_3, %c0_4] : memref<128x128xbf16, #tpu.memory_space<vmem>>, vector<128x128xbf16>
    tpu.vector_store %arg3[%c0_3, %c0_4], %3 {strides = array<i32>} : memref<128x128xbf16, #tpu.memory_space<vmem>>, vector<128x128xbf16>,
    return
  }
  func.func @transform_0(%arg0: i32) -> (i32, i32) {
    %c0_i32 = arith.constant 0 : i32
    %c0_i32_0 = arith.constant 0 : i32
    return %arg0, %c0_i32 : i32, i32
  }
  func.func @transform_1(%arg0: i32) -> (i32, i32) {
    %c0_i32 = arith.constant 0 : i32
    %c0_i32_0 = arith.constant 0 : i32
    %c0_i32_1 = arith.constant 0 : i32
    return %c0_i32, %c0_i32_0 : i32, i32
  }
  func.func @transform_2(%arg0: i32) -> (i32, i32) {
    %c0_i32 = arith.constant 0 : i32
    %c0_i32_0 = arith.constant 0 : i32
    return %arg0, %c0_i32 : i32, i32
  }
}

</mosaic_0001>

<bundles_post_ra>
// kernel: tpu_custom_call.1
= control target key start
LH: loop header
LB: loop body
LE: loop exit
PB: predicated region body
PF: predicated region fallthrough
CT: control target
= control target key end

     0   :  { %7 = vsyncpa [#allocation3], 0  ;;  %s648_s0 = inlined_call_operand.hbm [shape: bf16[128,128], index: 0, kind: input, shape index: {}]   ;;  %s649_s1 = inlined_call_operand.hbm [shape: bf16[128,128], index: 1, kind: input, shape index: {}]   ;;  %s650_s2 = inlined_call_operand.hbm [shape: bf16[128,128], index: 2, kind: output, shape index: {}]  }
   0x1   :  { %8 = vsyncpa [#allocation6], 0 }
   0x2   :  { %9 = vsyncpa [#allocation4], 0  ;;  %s610_s9 = smov [#allocation2]  }
   0x3   :  { %s15_s10 = sshll.u32 %s610_s9, 4  ;;  %s16_s10 = int_to_ptr.vmem [resolvable:$true] %s15_s10 }
   0x4   :  { %s552_s11 = scalar_lea.vmem %s16_s10, 1024  ;;  %p557_p1 = scmp.lt.s32.totalorder %s16_s10, %s16_s10 }
   0x5   :  { %p553_p0 = scmp.ne.s32.totalorder %s16_s10, %s552_s11  ;;  %p558_p2 = scmp.lt.s32.totalorder %s552_s11, %s552_s11 }
   0x7   :  { %p559_p3 = por %p558_p2, %p557_p1 }
   0x9   :  { %p560_p4 = pnand %p559_p3, %p553_p0 }
   0xb   :  { %563 = shalt.err (!%p560_p4)
}
   0xc   :  { %s611_s12 = smov 64   ;;  %s612_s13 = smov 4  }
   0xd   :  { %21 = dma.hbm_to_vmem [thread:$0]  %s648_s0, 1024, %s16_s10, [#allocation3], %s611_s12, %s611_s12, %s612_s13  }
   0xe   :  { %s613_s16 = smov [#allocation5]  }
   0xf   :  { %s27_s17 = sshll.u32 %s613_s16, 4  ;;  %s28_s17 = int_to_ptr.vmem [resolvable:$true] %s27_s17 }
  0x10   :  { %s572_s18 = scalar_lea.vmem %s28_s17, 1024  ;;  %p577_p6 = scmp.lt.s32.totalorder %s28_s17, %s28_s17 }
  0x11   :  { %p573_p5 = scmp.ne.s32.totalorder %s28_s17, %s572_s18  ;;  %p578_p7 = scmp.lt.s32.totalorder %s572_s18, %s572_s18 }
  0x13   :  { %p579_p8 = por %p578_p7, %p577_p6 }
  0x15   :  { %p580_p9 = pnand %p579_p8, %p573_p5 }
  0x17   :  { %583 = shalt.err (!%p580_p9)
}
  0x18   :  { %33 = dma.hbm_to_vmem [thread:$0]  %s649_s1, 1024, %s28_s17, [#allocation6], %s611_s12, %s611_s12, %s612_s13  }
  0x19   :  { %604 = dma.done.wait [#allocation3], 1024  }
  0x1a   :  { %605 = vsyncadd [#allocation3], 4294966272 }
  0x1b   :  { %606 = dma.done.wait [#allocation6], 1024  }
  0x1c   :  { %607 = vsyncadd [#allocation6], 4294966272  ;;  %v528_v0 = vld [vmem:[#allocation5 + $0x38] sm:$0xff]   ;;  %v529_v1 = vld [vmem:[#allocation5 + $0x30] sm:$0xff]   ;;  %s614_s0 = smov [#allocation7]  }
  0x1d   :  { %475 = vmatprep.subr.bf16.mxu0 %v528_v0  ;;  %507 = vmatprep.subr.bf16.mxu1 %v528_v0  ;;  %v530_v2 = vld [vmem:[#allocation5 + $0x28] sm:$0xff]   ;;  %v531_v3 = vld [vmem:[#allocation5 + $0x20] sm:$0xff]   ;;  %v532_v6 = vld [vmem:[#allocation5 + $0x18] sm:$0xff]   ;;  %s351_s1 = sshll.u32 %s614_s0, 4  ;;  %s352_s1 = int_to_ptr.vmem [resolvable:$true] %s351_s1 }
  0x1e   :  { %476 = vmatpush3.bf16.msra.mxu0 %v528_v0  ;;  %515 = vmatpush3.bf16.msra.mxu1 %v528_v0  ;;  %v536_v4 = vld [vmem:[#allocation2] sm:$0xff]   ;;  %v533_v7 = vld [vmem:[#allocation5 + $0x10] sm:$0xff]   ;;  %v534_v8 = vld [vmem:[#allocation5 + $0x8] sm:$0xff]   ;;  %s584_s21 = scalar_lea.vmem %s352_s1, 1024  ;;  %p589_p11 = scmp.lt.s32.totalorder %s352_s1, %s352_s1 }
  0x1f   :  { %477 = vmatprep.subr.bf16.mxu0 %v529_v1  ;;  %508 = vmatprep.subr.bf16.mxu1 %v529_v1  ;;  %v537_v5 = vld [vmem:[#allocation2 + $0x20] sm:$0xff]   ;;  %v538_v10 = vld [vmem:[#allocation2 + $0x8] sm:$0xff]   ;;  %v540_v12 = vld [vmem:[#allocation2 + $0x10] sm:$0xff]   ;;  %p585_p10 = scmp.ne.s32.totalorder %s352_s1, %s584_s21  ;;  %p590_p12 = scmp.lt.s32.totalorder %s584_s21, %s584_s21 }
  0x20   :  { %491 = vmatprep.mubr.bf16.mxu0 %v536_v4  ;;  %499 = vmatprep.mubr.bf16.mxu1 %v537_v5  ;;  %v535_v9 = vld [vmem:[#allocation5] sm:$0xff]   ;;  %v539_v11 = vld [vmem:[#allocation2 + $0x28] sm:$0xff]   ;;  %v541_v13 = vld [vmem:[#allocation2 + $0x30] sm:$0xff]  }
  0x21   :  { %v542_v14 = vld [vmem:[#allocation2 + $0x18] sm:$0xff]   ;;  %p591_p13 = por %p590_p12, %p589_p11 }
  0x22   :  { %478 = vmatpush3.bf16.msra.mxu0 %v529_v1  ;;  %516 = vmatpush3.bf16.msra.mxu1 %v529_v1  ;;  %v543_v15 = vld [vmem:[#allocation2 + $0x38] sm:$0xff]  }
  0x23   :  { %479 = vmatprep.subr.bf16.mxu0 %v530_v2  ;;  %509 = vmatprep.subr.bf16.mxu1 %v530_v2  ;;  %p592_p0 = pnand %p591_p13, %p585_p10 }
  0x26   :  { %480 = vmatpush3.bf16.msra.mxu0 %v530_v2  ;;  %517 = vmatpush3.bf16.msra.mxu1 %v530_v2 }
  0x27   :  { %481 = vmatprep.subr.bf16.mxu0 %v531_v3  ;;  %510 = vmatprep.subr.bf16.mxu1 %v531_v3 }
  0x2a   :  { %482 = vmatpush3.bf16.msra.mxu0 %v531_v3  ;;  %518 = vmatpush3.bf16.msra.mxu1 %v531_v3 }
  0x2b   :  { %483 = vmatprep.subr.bf16.mxu0 %v532_v6  ;;  %511 = vmatprep.subr.bf16.mxu1 %v532_v6 }
  0x2e   :  { %484 = vmatpush3.bf16.msra.mxu0 %v532_v6  ;;  %519 = vmatpush3.bf16.msra.mxu1 %v532_v6 }
  0x2f   :  { %485 = vmatprep.subr.bf16.mxu0 %v533_v7  ;;  %512 = vmatprep.subr.bf16.mxu1 %v533_v7 }
  0x32   :  { %486 = vmatpush3.bf16.msra.mxu0 %v533_v7  ;;  %520 = vmatpush3.bf16.msra.mxu1 %v533_v7 }
  0x33   :  { %487 = vmatprep.subr.bf16.mxu0 %v534_v8  ;;  %513 = vmatprep.subr.bf16.mxu1 %v534_v8 }
  0x36   :  { %488 = vmatpush3.bf16.msra.mxu0 %v534_v8  ;;  %521 = vmatpush3.bf16.msra.mxu1 %v534_v8 }
  0x37   :  { %489 = vmatprep.subr.bf16.mxu0 %v535_v9  ;;  %514 = vmatprep.subr.bf16.mxu1 %v535_v9 }
  0x3a   :  { %490 = vmatpush3.bf16.msra.mxu0 %v535_v9  ;;  %522 = vmatpush3.bf16.msra.mxu1 %v535_v9 }
  0x3d   :  { %492 = vmatmul.mubr.bf16.vlgmr.msra.gmra.mxu0 %v538_v10  ;;  %500 = vmatmul.mubr.bf16.vlgmr.msra.gmra.mxu1 %v539_v11 }
  0x3e   :  { %495 = vmatprep.mubr.bf16.mxu0 %v540_v12  ;;  %503 = vmatprep.mubr.bf16.mxu1 %v541_v13 }
  0x45   :  { %496 = vmatmul.mubr.bf16.gmra.mxu0 %v542_v14  ;;  %504 = vmatmul.mubr.bf16.gmra.mxu1 %v543_v15 }
  0xfd   :  { %v493_v16 = vpop.f32.mrf.mxu0  ;;  %v501_v17 = vpop.f32.mrf.mxu1 }
  0xff   :  { %v203_v18 = vpop.f32.mrf.mxu0  ;;  %v235_v19 = vpop.f32.mrf.mxu1 }
 0x101   :  { %v494_v20 = vpop.f32.mrf.mxu0  ;;  %v502_v21 = vpop.f32.mrf.mxu1 }
 0x102   :  { %v420_v22 = vpack.c.bf16 %v494_v20, %v493_v16  ;;  %v440_v23 = vpack.c.bf16 %v502_v21, %v501_v17 }
 0x103   :  { %v206_v24 = vpop.f32.mrf.mxu0  ;;  %v238_v25 = vpop.f32.mrf.mxu1 }
 0x104   :  { %452 = vst [vmem:[#allocation7 + $0x8] sm:$0xff] %v420_v22   ;;  %456 = vst [vmem:[#allocation7 + $0x28] sm:$0xff] %v440_v23   ;;  %v415_v26 = vpack.c.bf16 %v206_v24, %v203_v18  ;;  %v435_v27 = vpack.c.bf16 %v238_v25, %v235_v19 }
 0x105   :  { %v497_v28 = vpop.f32.mrf.mxu0  ;;  %v505_v29 = vpop.f32.mrf.mxu1 }
 0x106   :  { %416 = vst [vmem:[#allocation7] sm:$0xff] %v415_v26   ;;  %455 = vst [vmem:[#allocation7 + $0x20] sm:$0xff] %v435_v27  }
 0x107   :  { %v219_v30 = vpop.f32.mrf.mxu0  ;;  %v251_v31 = vpop.f32.mrf.mxu1 }
 0x109   :  { %v498_v32 = vpop.f32.mrf.mxu0  ;;  %v506_v33 = vpop.f32.mrf.mxu1 }
 0x10a   :  { %v430_v34 = vpack.c.bf16 %v498_v32, %v497_v28  ;;  %v450_v35 = vpack.c.bf16 %v506_v33, %v505_v29 }
 0x10b   :  { %v222_v36 = vpop.f32.mrf.mxu0  ;;  %v254_v37 = vpop.f32.mrf.mxu1 }
 0x10c   :  { %454 = vst [vmem:[#allocation7 + $0x18] sm:$0xff] %v430_v34   ;;  %458 = vst [vmem:[#allocation7 + $0x38] sm:$0xff] %v450_v35   ;;  %v425_v38 = vpack.c.bf16 %v222_v36, %v219_v30  ;;  %v445_v39 = vpack.c.bf16 %v254_v37, %v251_v31 }
 0x10e   :  { %453 = vst [vmem:[#allocation7 + $0x10] sm:$0xff] %v425_v38   ;;  %457 = vst [vmem:[#allocation7 + $0x30] sm:$0xff] %v445_v39  }
 0x10f   :  { %595 = shalt.err (!%p592_p0)
}
 0x110   :  { %357 = dma.vmem_to_hbm [thread:$0]  %s352_s1, 1024, %s650_s2, [#allocation4], %s611_s12, %s611_s12, %s612_s13  }
 0x111   :  { %608 = dma.done.wait [#allocation4], 1024  }
 0x112   :  { %609 = vsyncadd [#allocation4], 4294966272 }
 0x113   :  { %361 = vsyncpa [#allocation3], 1 }
 0x114   :  { %362 = vsyncpa [#allocation6], 1 }
 0x115   :  { %363 = vsyncpa [#allocation4], 1 }

</bundles_post_ra>
